<compile_context>
chip_gen: v7x
topology: tpu7x:2x2x1
jax: 0.10.0
libtpu: 0.0.40
codegen_flags: <defaults>
</compile_context>

<pallas_src>
import functools

import jax
import jax.numpy as jnp
from jax.experimental import pallas as pl
from jax.experimental.pallas import tpu as pltpu


# ---------------------------------------------------------------------------
# Kernels
# ---------------------------------------------------------------------------
def feature_transform_kernel(x_ref, w_ref, o_ref):
    """o[i] = X[i] @ W  -- hoisted out of the aggregation grid, computed once per row tile."""
    o_ref[...] = jnp.dot(
        x_ref[...], w_ref[...], preferred_element_type=jnp.float32
    ).astype(o_ref.dtype)


def gcn_aggregate_kernel(a_ref, xw_ref, b_ref, o_ref, acc_ref, *, relu):
    """out[i] = act( sum_k A[i,k] @ XW[k] + b ) with an f32 VMEM accumulator (bf16 output)."""
    k = pl.program_id(1)

    @pl.when(k == 0)
    def _():
        acc_ref[...] = jnp.zeros_like(acc_ref)

    acc_ref[...] += jnp.dot(a_ref[...], xw_ref[...], preferred_element_type=jnp.float32)

    @pl.when(k == pl.num_programs(1) - 1)
    def _():
        out = acc_ref[...] + b_ref[...]
        if relu:
            out = jnp.maximum(out, 0.0)
        o_ref[...] = out.astype(o_ref.dtype)


def gcn_aggregate_dual_kernel(a_ref, xw_ref, b_ref, o_ref, o_bf16_ref):
    """Layer-2 variant: accumulate directly into the resident f32 output block (no extra
    scratch) and emit a bf16 copy of Z from the same finalize for the decoder (avoids a
    separate astype pass through HBM)."""
    k = pl.program_id(1)

    @pl.when(k == 0)
    def _():
        o_ref[...] = jnp.zeros_like(o_ref)

    o_ref[...] += jnp.dot(a_ref[...], xw_ref[...], preferred_element_type=jnp.float32)

    @pl.when(k == pl.num_programs(1) - 1)
    def _():
        z = o_ref[...] + b_ref[...]
        o_ref[...] = z
        o_bf16_ref[...] = z.astype(o_bf16_ref.dtype)


def decoder_kernel(zi_ref, zj_ref, adj_ref):
    """adj[i, j] = sigmoid( Z[i] @ Z[j]^T ) via a last-axis contraction (no z.T copy)."""
    logits = jax.lax.dot_general(
        zi_ref[...],
        zj_ref[...],
        dimension_numbers=(((1,), (1,)), ((), ())),
        preferred_element_type=jnp.float32,
    )
    adj_ref[...] = jax.nn.sigmoid(logits).astype(adj_ref.dtype)


# ---------------------------------------------------------------------------
# Tiling / VMEM helpers
# ---------------------------------------------------------------------------
def _vmem_limit_bytes():
    cap = 64 * 1024 * 1024  # v7x-safe default (64 MiB physical VMEM per TensorCore)
    try:
        info = pltpu.get_tpu_info()
        cap = int(getattr(info, "vmem_capacity_bytes", cap))
    except Exception:
        pass
    # ~75% of physical: ~96 MiB on 128 MiB v5e/v6e parts, ~48 MiB on 64 MiB v7x parts.
    return min((cap * 3) // 4, 100 * 1024 * 1024)


def _round_up(v, m):
    return ((v + m - 1) // m) * m


def _pick_tile(dim, max_tile, unit=128):
    """Largest multiple of `unit` that divides `dim` and is <= max_tile (dim % unit == 0)."""
    t = max(unit, (min(max_tile, dim) // unit) * unit)
    while dim % t:
        t -= unit
    return t


def _pick_parallel_tile(dim, max_tile, unit=128):
    """Like _pick_tile, but keeps >= 2 blocks when possible so both v7x TensorCores get work."""
    t = _pick_tile(dim, max_tile, unit)
    if dim // t < 2 and dim >= 2 * unit:
        t = _pick_tile(dim, dim // 2, unit)
    return t


def _pad2(x, rows, cols):
    return jnp.pad(x, ((0, rows - x.shape[0]), (0, cols - x.shape[1])))


# ---------------------------------------------------------------------------
# Pallas wrappers
# ---------------------------------------------------------------------------
def _feature_transform(x, w, *, node_tile, vmem_limit):
    """XW = X @ W, computed once per layer (bf16 output for the MXU aggregation pass)."""
    n_pad, c_in = x.shape
    c_out = w.shape[1]
    tm = _pick_parallel_tile(n_pad, node_tile)
    grid = (n_pad // tm,)

    flops = 2 * n_pad * c_in * c_out
    bytes_accessed = (
        x.size * x.dtype.itemsize + w.size * w.dtype.itemsize + n_pad * c_out * 2
    )

    return pl.pallas_call(
        feature_transform_kernel,
        out_shape=jax.ShapeDtypeStruct((n_pad, c_out), jnp.bfloat16),
        grid_spec=pltpu.PrefetchScalarGridSpec(
            num_scalar_prefetch=0,
            grid=grid,
            in_specs=[
                pl.BlockSpec((tm, c_in), lambda i: (i, 0)),
                pl.BlockSpec((c_in, c_out), lambda i: (0, 0)),   # W resident
            ],
            out_specs=pl.BlockSpec((tm, c_out), lambda i: (i, 0)),
        ),
        compiler_params=pltpu.CompilerParams(
            dimension_semantics=("parallel",),
            vmem_limit_bytes=vmem_limit,
        ),
        cost_estimate=pl.CostEstimate(
            flops=int(flops), transcendentals=0, bytes_accessed=int(bytes_accessed)
        ),
    )(x, w)


def _gcn_aggregate(a, xw, b, *, relu, out_dtype, node_tile, vmem_limit):
    """out = act(A_hat @ XW + b), tiled (row tile i parallel, K tile k reduction)."""
    n_pad = a.shape[0]
    c_out = xw.shape[1]
    tm = _pick_parallel_tile(n_pad, node_tile)   # parallel row axis (>= 2 blocks when possible)
    tk = _pick_tile(n_pad, node_tile)            # reduction axis (>= 256 fills the 256-deep MXU)
    grid = (n_pad // tm, n_pad // tk)

    flops = 2 * n_pad * n_pad * c_out
    bytes_accessed = (
        a.size * a.dtype.itemsize
        + xw.size * xw.dtype.itemsize * grid[0]   # XW k-blocks re-read once per row tile
        + b.size * b.dtype.itemsize
        + n_pad * c_out * jnp.dtype(out_dtype).itemsize
    )

    # TODO(synk): if an xprof/bundle trace on v7x shows exposed DMA gaps on the A_hat stream,
    # add pipeline_mode=pl.Buffered(3) to in_specs[0].
    return pl.pallas_call(
        functools.partial(gcn_aggregate_kernel, relu=relu),
        out_shape=jax.ShapeDtypeStruct((n_pad, c_out), out_dtype),
        grid_spec=pltpu.PrefetchScalarGridSpec(
            num_scalar_prefetch=0,
            grid=grid,
            in_specs=[
                pl.BlockSpec((tm, tk), lambda i, k: (i, k)),      # A_hat tile (dominant stream)
                pl.BlockSpec((tk, c_out), lambda i, k: (k, 0)),   # XW k-block
                pl.BlockSpec((1, c_out), lambda i, k: (0, 0)),    # bias (resident)
            ],
            out_specs=pl.BlockSpec((tm, c_out), lambda i, k: (i, 0)),
            scratch_shapes=[pltpu.VMEM((tm, c_out), jnp.float32)],
        ),
        compiler_params=pltpu.CompilerParams(
            dimension_semantics=("parallel", "arbitrary"),
            vmem_limit_bytes=vmem_limit,
        ),
        cost_estimate=pl.CostEstimate(
            flops=int(flops), transcendentals=0, bytes_accessed=int(bytes_accessed)
        ),
    )(a, xw, b)


def _gcn_aggregate_dual(a, xw, b, *, node_tile, vmem_limit):
    """Layer 2: Z = A_hat @ XW + b; returns (Z f32, Z bf16) from one pass."""
    n_pad = a.shape[0]
    c_out = xw.shape[1]
    tm = _pick_parallel_tile(n_pad, node_tile)
    tk = _pick_tile(n_pad, node_tile)
    grid = (n_pad // tm, n_pad // tk)

    flops = 2 * n_pad * n_pad * c_out
    bytes_accessed = (
        a.size * a.dtype.itemsize
        + xw.size * xw.dtype.itemsize * grid[0]
        + b.size * b.dtype.itemsize
        + n_pad * c_out * (4 + 2)
    )

    return pl.pallas_call(
        gcn_aggregate_dual_kernel,
        out_shape=(
            jax.ShapeDtypeStruct((n_pad, c_out), jnp.float32),
            jax.ShapeDtypeStruct((n_pad, c_out), jnp.bfloat16),
        ),
        grid_spec=pltpu.PrefetchScalarGridSpec(
            num_scalar_prefetch=0,
            grid=grid,
            in_specs=[
                pl.BlockSpec((tm, tk), lambda i, k: (i, k)),
                pl.BlockSpec((tk, c_out), lambda i, k: (k, 0)),
                pl.BlockSpec((1, c_out), lambda i, k: (0, 0)),
            ],
            out_specs=[
                pl.BlockSpec((tm, c_out), lambda i, k: (i, 0)),   # f32 Z (accumulated in place)
                pl.BlockSpec((tm, c_out), lambda i, k: (i, 0)),   # bf16 Z copy for the decoder
            ],
        ),
        compiler_params=pltpu.CompilerParams(
            dimension_semantics=("parallel", "arbitrary"),
            vmem_limit_bytes=vmem_limit,
        ),
        cost_estimate=pl.CostEstimate(
            flops=int(flops), transcendentals=0, bytes_accessed=int(bytes_accessed)
        ),
    )(a, xw, b)


def _decode(z_bf16, *, decode_tile, vmem_limit, out_dtype):
    """adj = sigmoid(Z Z^T), (i, j) grid, both axes parallel."""
    n_pad, c = z_bf16.shape
    tm = _pick_parallel_tile(n_pad, decode_tile)
    tn = _pick_tile(n_pad, decode_tile)
    grid = (n_pad // tm, n_pad // tn)

    flops = 2 * n_pad * n_pad * c
    bytes_accessed = (
        z_bf16.size * z_bf16.dtype.itemsize * (grid[0] + grid[1])
        + n_pad * n_pad * jnp.dtype(out_dtype).itemsize
    )

    # TODO(synk): exploit symmetry (j >= i blocks only) if downstream only needs unique pairs.
    return pl.pallas_call(
        decoder_kernel,
        out_shape=jax.ShapeDtypeStruct((n_pad, n_pad), out_dtype),
        grid_spec=pltpu.PrefetchScalarGridSpec(
            num_scalar_prefetch=0,
            grid=grid,
            in_specs=[
                pl.BlockSpec((tm, c), lambda i, j: (i, 0)),
                pl.BlockSpec((tn, c), lambda i, j: (j, 0)),
            ],
            out_specs=pl.BlockSpec((tm, tn), lambda i, j: (i, j)),
        ),
        compiler_params=pltpu.CompilerParams(
            dimension_semantics=("parallel", "parallel"),
            vmem_limit_bytes=vmem_limit,
        ),
        cost_estimate=pl.CostEstimate(
            flops=int(flops),
            transcendentals=int(n_pad * n_pad),
            bytes_accessed=int(bytes_accessed),
        ),
    )(z_bf16, z_bf16)


# ---------------------------------------------------------------------------
# Full forward
# ---------------------------------------------------------------------------
def graph_autoencoder_forward(a_hat, x, w1, b1, w2, b2, *,
                              node_tile=512, decode_tile=1024,
                              adj_dtype=jnp.bfloat16):
    """Full GAE forward: z = GCN2(relu(GCN1(x))), adj_rec = sigmoid(z z^T)."""
    n = x.shape[0]
    c_in, c_hid = w1.shape
    c_out = w2.shape[1]

    # Pad the node dim so large graphs tile evenly at node_tile; small graphs just to 128.
    pad_unit = 128 if n <= node_tile else node_tile
    n_pad = _round_up(n, pad_unit)
    ci_pad = _round_up(c_in, 128)
    ch_pad = _round_up(c_hid, 128)
    co_pad = _round_up(c_out, 128)

    # Lane-dense (128-padded) bf16 MXU operands; biases stay f32 (VPU math in f32).
    a_p = _pad2(a_hat, n_pad, n_pad).astype(jnp.bfloat16)
    x_p = _pad2(x, n_pad, ci_pad).astype(jnp.bfloat16)
    w1_p = _pad2(w1, ci_pad, ch_pad).astype(jnp.bfloat16)
    b1_p = _pad2(b1, 1, ch_pad).astype(jnp.float32)
    w2_p = _pad2(w2, ch_pad, co_pad).astype(jnp.bfloat16)
    b2_p = _pad2(b2, 1, co_pad).astype(jnp.float32)

    vmem_limit = _vmem_limit_bytes()

    # Layer 1: H = relu(A_hat @ (X W1) + b1)   (X W1 hoisted out of the reduction grid)
    xw1 = _feature_transform(x_p, w1_p, node_tile=node_tile, vmem_limit=vmem_limit)
    h_p = _gcn_aggregate(a_p, xw1, b1_p, relu=True, out_dtype=jnp.bfloat16,
                         node_tile=node_tile, vmem_limit=vmem_limit)

    # Layer 2: Z = A_hat @ (H W2) + b2   (f32 Z returned + bf16 copy for the decoder)
    xw2 = _feature_transform(h_p, w2_p, node_tile=node_tile, vmem_limit=vmem_limit)
    z_p, z_bf16 = _gcn_aggregate_dual(a_p, xw2, b2_p,
                                      node_tile=node_tile, vmem_limit=vmem_limit)

    # Decoder: adj = sigmoid(Z Z^T)  (bf16 output by default; the decoder is write-bound)
    adj_p = _decode(z_bf16, decode_tile=decode_tile, vmem_limit=vmem_limit,
                    out_dtype=adj_dtype)

    return z_p[:n, :c_out], adj_p[:n, :n]


# ---------------------------------------------------------------------------
# Graph / parameter construction (wrapper-side, pure JAX)
# ---------------------------------------------------------------------------
def normalized_adjacency(edge_index, num_nodes):
    """Dense D^{-1/2} (A + I) D^{-1/2}, aggregation at target nodes (PyG GCNConv)."""
    src = edge_index[0]
    dst = edge_index[1]
    a = jnp.zeros((num_nodes, num_nodes), jnp.float32)
    a = a.at[dst, src].add(1.0)                       # A[i, j] = 1 iff edge j -> i
    a = a + jnp.eye(num_nodes, dtype=jnp.float32)     # self-loops
    deg = a.sum(axis=1)
    dinv = jnp.where(deg > 0.0, 1.0 / jnp.sqrt(deg), 0.0)
    return dinv[:, None] * a * dinv[None, :]


def glorot(key, shape):
    fan_in, fan_out = shape
    limit = jnp.sqrt(6.0 / (fan_in + fan_out))
    return jax.random.uniform(key, shape, jnp.float32, -limit, limit)


if __name__ == "__main__":
    key = jax.random.PRNGKey(0)
    k_x, k_w1, k_w2 = jax.random.split(key, 3)

    num_nodes = 16
    in_channels = 8
    hidden_channels = 32
    out_channels = 16

    # Deterministic graph: bidirectional ring over the nodes.
    fwd = jnp.arange(num_nodes, dtype=jnp.int32)
    nxt = (fwd + 1) % num_nodes
    edge_index = jnp.stack(
        [jnp.concatenate([fwd, nxt]), jnp.concatenate([nxt, fwd])], axis=0
    )  # (2, 2N)

    x = jax.random.normal(k_x, (num_nodes, in_channels), jnp.float32)

    # GCNConv params: glorot weights stored as (in, out) so the kernel does X @ W; bias zeros.
    w1 = glorot(k_w1, (in_channels, hidden_channels))
    b1 = jnp.zeros((1, hidden_channels), jnp.float32)
    w2 = glorot(k_w2, (hidden_channels, out_channels))
    b2 = jnp.zeros((1, out_channels), jnp.float32)

    a_hat = normalized_adjacency(edge_index, num_nodes)

    z, adj_rec = graph_autoencoder_forward(a_hat, x, w1, b1, w2, b2)
    jax.block_until_ready((z, adj_rec))

    # Pure-f32 JAX reference (kernel uses bf16 MXU inputs with f32 accumulation and a bf16
    # decoder output, so tolerances account for bf16 rounding; they are N-dependent).
    h_ref = jnp.maximum(a_hat @ (x @ w1) + b1, 0.0)
    z_ref = a_hat @ (h_ref @ w2) + b2
    adj_ref = jax.nn.sigmoid(z_ref @ z_ref.T)

    assert z.shape == (num_nodes, out_channels)
    assert adj_rec.shape == (num_nodes, num_nodes)
    assert jnp.allclose(z, z_ref, atol=3e-2), "z mismatch"
    assert jnp.allclose(adj_rec.astype(jnp.float32), adj_ref, atol=3e-2), "adj_rec mismatch"

    print("KERNEL_OK")
</pallas_src>

<mosaic_0001>
module attributes {stable_mosaic.version = 11 : i64} {
  func.func @feature_transform_kernel(%arg0: i32, %arg1: memref<128x128xbf16, #tpu.memory_space<vmem>>, %arg2: memref<128x128xbf16, #tpu.memory_space<vmem>>, %arg3: memref<128x128xbf16, #tpu.memory_space<vmem>>) attributes {dimension_semantics = [#tpu.dimension_semantics<parallel>], iteration_bounds = array<i64: 1>, scalar_prefetch = 0 : i64, scratch_operands = 0 : i64, tpu.core_type = #tpu.core_type<tc>, window_params = [{transform_indices = @transform_0, window_bounds = array<i64: 128, 128>}, {pipeline_mode = #tpu.pipeline_mode<synchronous>, transform_indices = @transform_1, window_bounds = array<i64: 128, 128>}, {transform_indices = @transform_2, window_bounds = array<i64: 128, 128>}]} {
    %c0 = arith.constant 0 : index
    %c0_0 = arith.constant 0 : index
    %0 = vector.load %arg1[%c0, %c0_0] : memref<128x128xbf16, #tpu.memory_space<vmem>>, vector<128x128xbf16>
    %c0_1 = arith.constant 0 : index
    %c0_2 = arith.constant 0 : index
    %1 = vector.load %arg2[%c0_1, %c0_2] : memref<128x128xbf16, #tpu.memory_space<vmem>>, vector<128x128xbf16>
    %cst = arith.constant dense<0.000000e+00> : vector<128x128xf32>
    %2 = tpu.matmul %0, %1, %cst {dimension_numbers = #tpu.dot_dimension_numbers<[1], [0], [0], [1], [0, 0, 1, 1], [], []>} : vector<128x128xbf16>, vector<128x128xbf16>, vector<128x128xf32> -> vector<128x128xf32>
    %3 = arith.truncf %2 : vector<128x128xf32> to vector<128x128xbf16>
    %c0_3 = arith.constant 0 : index
    %c0_4 = arith.constant 0 : index
    %4 = vector.load %arg3[%c0_3, %c0_4] : memref<128x128xbf16, #tpu.memory_space<vmem>>, vector<128x128xbf16>
    tpu.vector_store %arg3[%c0_3, %c0_4], %3 {strides = array<i32>} : memref<128x128xbf16, #tpu.memory_space<vmem>>, vector<128x128xbf16>,
    return
  }
  func.func @transform_0(%arg0: i32) -> (i32, i32) {
    %c0_i32 = arith.constant 0 : i32
    %c0_i32_0 = arith.constant 0 : i32
    return %arg0, %c0_i32 : i32, i32
  }
  func.func @transform_1(%arg0: i32) -> (i32, i32) {
    %c0_i32 = arith.constant 0 : i32
    %c0_i32_0 = arith.constant 0 : i32
    %c0_i32_1 = arith.constant 0 : i32
    return %c0_i32, %c0_i32_0 : i32, i32
  }
  func.func @transform_2(%arg0: i32) -> (i32, i32) {
    %c0_i32 = arith.constant 0 : i32
    %c0_i32_0 = arith.constant 0 : i32
    return %arg0, %c0_i32 : i32, i32
  }
}

</mosaic_0001>

<bundles_post_ra>
// kernel: tpu_custom_call.1
= control target key start
LH: loop header
LB: loop body
LE: loop exit
PB: predicated region body
PF: predicated region fallthrough
CT: control target
= control target key end

     0   :  { %7 = vsyncpa [#allocation3], 0  ;;  %s681_s0 = inlined_call_operand.hbm [shape: bf16[128,128], index: 0, kind: input, shape index: {}]   ;;  %s682_s1 = inlined_call_operand.hbm [shape: bf16[128,128], index: 1, kind: input, shape index: {}]   ;;  %s683_s2 = inlined_call_operand.hbm [shape: bf16[128,128], index: 2, kind: output, shape index: {}]  }
   0x1   :  { %8 = vsyncpa [#allocation6], 0 }
   0x2   :  { %9 = vsyncpa [#allocation4], 0  ;;  %s616_s9 = smov [#allocation2]   ;;  %s544_s13 = scalar_lea.hbm %s681_s0, 1024 }
   0x3   :  { %s15_s10 = sshll.u32 %s616_s9, 4  ;;  %p545_p0 = scmp.ne.s32.totalorder %s681_s0, %s544_s13  ;;  %s16_s10 = int_to_ptr.vmem [resolvable:$true] %s15_s10 }
   0x4   :  { %p548_p1 = scmp.lt.u32.totalorder %s544_s13, %s681_s0 }
   0x6   :  { %p550_p2 = pnand %p548_p1, %p545_p0 }
   0x8   :  { %553 = shalt.err (!%p550_p2)
}
   0x9   :  { %s554_s18 = scalar_lea.vmem %s16_s10, 1024  ;;  %p559_p4 = scmp.lt.s32.totalorder %s16_s10, %s16_s10 }
   0xa   :  { %p555_p3 = scmp.ne.s32.totalorder %s16_s10, %s554_s18  ;;  %p560_p5 = scmp.lt.s32.totalorder %s554_s18, %s554_s18 }
   0xc   :  { %p561_p6 = por %p560_p5, %p559_p4 }
   0xe   :  { %p562_p7 = pnand %p561_p6, %p555_p3 }
  0x10   :  { %565 = shalt.err (!%p562_p7)
}
  0x11   :  { %s617_s19 = smov 64   ;;  %s618_s20 = smov 4  }
  0x12   :  { %21 = dma.hbm_to_vmem [thread:$0]  %s681_s0, 1024, %s16_s10, [#allocation3], %s617_s19, %s617_s19, %s618_s20  }
  0x13   :  { %s619_s23 = smov [#allocation5]   ;;  %s566_s27 = scalar_lea.hbm %s682_s1, 1024 }
  0x14   :  { %s27_s24 = sshll.u32 %s619_s23, 4  ;;  %p567_p8 = scmp.ne.s32.totalorder %s682_s1, %s566_s27  ;;  %s28_s24 = int_to_ptr.vmem [resolvable:$true] %s27_s24 }
  0x15   :  { %p570_p9 = scmp.lt.u32.totalorder %s566_s27, %s682_s1 }
  0x17   :  { %p572_p10 = pnand %p570_p9, %p567_p8 }
  0x19   :  { %575 = shalt.err (!%p572_p10)
}
  0x1a   :  { %s576_s4 = scalar_lea.vmem %s28_s24, 1024  ;;  %p581_p12 = scmp.lt.s32.totalorder %s28_s24, %s28_s24 }
  0x1b   :  { %p577_p11 = scmp.ne.s32.totalorder %s28_s24, %s576_s4  ;;  %p582_p13 = scmp.lt.s32.totalorder %s576_s4, %s576_s4 }
  0x1d   :  { %p583_p0 = por %p582_p13, %p581_p12 }
  0x1f   :  { %p584_p1 = pnand %p583_p0, %p577_p11 }
  0x21   :  { %587 = shalt.err (!%p584_p1)
}
  0x22   :  { %33 = dma.hbm_to_vmem [thread:$0]  %s682_s1, 1024, %s28_s24, [#allocation6], %s617_s19, %s617_s19, %s618_s20  }
  0x23   :  { %610 = dma.done.wait [#allocation3], 1024  }
  0x24   :  { %611 = vsyncadd [#allocation3], 4294966272 }
  0x25   :  { %612 = dma.done.wait [#allocation6], 1024  }
  0x26   :  { %613 = vsyncadd [#allocation6], 4294966272  ;;  %v528_v0 = vld [vmem:[#allocation5] sm:$0xff]   ;;  %v529_v1 = vld [vmem:[#allocation5 + $0x8] sm:$0xff]   ;;  %s620_s1 = smov [#allocation7]  }
  0x27   :  { %475 = vmatprep.subr.bf16.mxu0 %v528_v0  ;;  %507 = vmatprep.subr.bf16.mxu1 %v528_v0  ;;  %v530_v2 = vld [vmem:[#allocation5 + $0x10] sm:$0xff]   ;;  %v531_v3 = vld [vmem:[#allocation5 + $0x18] sm:$0xff]   ;;  %v536_v4 = vld [vmem:[#allocation2] sm:$0xff]   ;;  %s351_s6 = sshll.u32 %s620_s1, 4  ;;  %s352_s6 = int_to_ptr.vmem [resolvable:$true] %s351_s6 }
  0x28   :  { %476 = vmatpush3.bf16.msra.mxu0 %v528_v0  ;;  %515 = vmatpush3.bf16.msra.mxu1 %v528_v0  ;;  %v537_v5 = vld [vmem:[#allocation2 + $0x20] sm:$0xff]   ;;  %v533_v7 = vld [vmem:[#allocation5 + $0x28] sm:$0xff]   ;;  %v534_v8 = vld [vmem:[#allocation5 + $0x30] sm:$0xff]   ;;  %s588_s7 = scalar_lea.vmem %s352_s6, 1024  ;;  %p593_p3 = scmp.lt.s32.totalorder %s352_s6, %s352_s6 }
  0x29   :  { %477 = vmatprep.subr.bf16.mxu0 %v529_v1  ;;  %508 = vmatprep.subr.bf16.mxu1 %v529_v1  ;;  %v532_v6 = vld [vmem:[#allocation5 + $0x20] sm:$0xff]   ;;  %v535_v9 = vld [vmem:[#allocation5 + $0x38] sm:$0xff]   ;;  %v538_v10 = vld [vmem:[#allocation2 + $0x8] sm:$0xff]   ;;  %p589_p2 = scmp.ne.s32.totalorder %s352_s6, %s588_s7  ;;  %p594_p4 = scmp.lt.s32.totalorder %s588_s7, %s588_s7 }
  0x2a   :  { %491 = vmatprep.mubr.bf16.mxu0 %v536_v4  ;;  %499 = vmatprep.mubr.bf16.mxu1 %v537_v5  ;;  %v539_v11 = vld [vmem:[#allocation2 + $0x28] sm:$0xff]   ;;  %v540_v12 = vld [vmem:[#allocation2 + $0x10] sm:$0xff]   ;;  %v542_v14 = vld [vmem:[#allocation2 + $0x18] sm:$0xff]  }
  0x2b   :  { %v541_v13 = vld [vmem:[#allocation2 + $0x30] sm:$0xff]   ;;  %v543_v15 = vld [vmem:[#allocation2 + $0x38] sm:$0xff]   ;;  %p595_p5 = por %p594_p4, %p593_p3 }
  0x2c   :  { %478 = vmatpush3.bf16.msra.mxu0 %v529_v1  ;;  %516 = vmatpush3.bf16.msra.mxu1 %v529_v1 }
  0x2d   :  { %479 = vmatprep.subr.bf16.mxu0 %v530_v2  ;;  %509 = vmatprep.subr.bf16.mxu1 %v530_v2  ;;  %p596_p6 = pnand %p595_p5, %p589_p2 }
  0x30   :  { %480 = vmatpush3.bf16.msra.mxu0 %v530_v2  ;;  %517 = vmatpush3.bf16.msra.mxu1 %v530_v2 }
  0x31   :  { %481 = vmatprep.subr.bf16.mxu0 %v531_v3  ;;  %510 = vmatprep.subr.bf16.mxu1 %v531_v3 }
  0x34   :  { %482 = vmatpush3.bf16.msra.mxu0 %v531_v3  ;;  %518 = vmatpush3.bf16.msra.mxu1 %v531_v3 }
  0x35   :  { %483 = vmatprep.subr.bf16.mxu0 %v532_v6  ;;  %511 = vmatprep.subr.bf16.mxu1 %v532_v6 }
  0x38   :  { %484 = vmatpush3.bf16.msra.mxu0 %v532_v6  ;;  %519 = vmatpush3.bf16.msra.mxu1 %v532_v6 }
  0x39   :  { %485 = vmatprep.subr.bf16.mxu0 %v533_v7  ;;  %512 = vmatprep.subr.bf16.mxu1 %v533_v7 }
  0x3c   :  { %486 = vmatpush3.bf16.msra.mxu0 %v533_v7  ;;  %520 = vmatpush3.bf16.msra.mxu1 %v533_v7 }
  0x3d   :  { %487 = vmatprep.subr.bf16.mxu0 %v534_v8  ;;  %513 = vmatprep.subr.bf16.mxu1 %v534_v8 }
  0x40   :  { %488 = vmatpush3.bf16.msra.mxu0 %v534_v8  ;;  %521 = vmatpush3.bf16.msra.mxu1 %v534_v8 }
  0x41   :  { %489 = vmatprep.subr.bf16.mxu0 %v535_v9  ;;  %514 = vmatprep.subr.bf16.mxu1 %v535_v9 }
  0x44   :  { %490 = vmatpush3.bf16.msra.mxu0 %v535_v9  ;;  %522 = vmatpush3.bf16.msra.mxu1 %v535_v9 }
  0x47   :  { %492 = vmatmul.mubr.bf16.vlgmr.msra.gmra.mrb[0].mxu0 %v538_v10  ;;  %500 = vmatmul.mubr.bf16.vlgmr.msra.gmra.mrb[0].mxu1 %v539_v11 }
  0x48   :  { %495 = vmatprep.mubr.bf16.mxu0 %v540_v12  ;;  %503 = vmatprep.mubr.bf16.mxu1 %v541_v13 }
  0x4f   :  { %496 = vmatmul.mubr.bf16.gmra.mrb[4].mxu0 %v542_v14  ;;  %504 = vmatmul.mubr.bf16.gmra.mrb[4].mxu1 %v543_v15 }
 0x11a   :  { %v493_v16 = vpop.f32.mrb[0].mxu0  ;;  %v501_v17 = vpop.f32.mrb[0].mxu1 }
 0x11b   :  { %v203_v18 = vpop.f32.mrb[1].mxu0  ;;  %v235_v19 = vpop.f32.mrb[1].mxu1 }
 0x11c   :  { %v494_v20 = vpop.f32.mrb[2].mxu0  ;;  %v502_v21 = vpop.f32.mrb[2].mxu1 }
 0x11d   :  { %v420_v22 = vpack.c.bf16 %v494_v20, %v493_v16  ;;  %v440_v23 = vpack.c.bf16 %v502_v21, %v501_v17  ;;  %v206_v24 = vpop.f32.mrb[3].mxu0  ;;  %v238_v25 = vpop.f32.mrb[3].mxu1 }
 0x11e   :  { %v415_v26 = vpack.c.bf16 %v206_v24, %v203_v18  ;;  %v435_v27 = vpack.c.bf16 %v238_v25, %v235_v19 }
 0x11f   :  { %452 = vst [vmem:[#allocation7 + $0x8] sm:$0xff] %v420_v22   ;;  %456 = vst [vmem:[#allocation7 + $0x28] sm:$0xff] %v440_v23  }
 0x120   :  { %416 = vst [vmem:[#allocation7] sm:$0xff] %v415_v26   ;;  %455 = vst [vmem:[#allocation7 + $0x20] sm:$0xff] %v435_v27  }
 0x122   :  { %v497_v28 = vpop.f32.mrb[4].mxu0  ;;  %v505_v29 = vpop.f32.mrb[4].mxu1 }
 0x123   :  { %v219_v30 = vpop.f32.mrb[5].mxu0  ;;  %v251_v31 = vpop.f32.mrb[5].mxu1 }
 0x124   :  { %v498_v32 = vpop.f32.mrb[6].mxu0  ;;  %v506_v33 = vpop.f32.mrb[6].mxu1 }
 0x125   :  { %v430_v34 = vpack.c.bf16 %v498_v32, %v497_v28  ;;  %v450_v35 = vpack.c.bf16 %v506_v33, %v505_v29  ;;  %v222_v36 = vpop.f32.mrb[7].mxu0  ;;  %v254_v37 = vpop.f32.mrb[7].mxu1 }
 0x126   :  { %v425_v38 = vpack.c.bf16 %v222_v36, %v219_v30  ;;  %v445_v39 = vpack.c.bf16 %v254_v37, %v251_v31 }
 0x127   :  { %454 = vst [vmem:[#allocation7 + $0x18] sm:$0xff] %v430_v34   ;;  %458 = vst [vmem:[#allocation7 + $0x38] sm:$0xff] %v450_v35  }
 0x128   :  { %453 = vst [vmem:[#allocation7 + $0x10] sm:$0xff] %v425_v38   ;;  %457 = vst [vmem:[#allocation7 + $0x30] sm:$0xff] %v445_v39  }
 0x129   :  { %599 = shalt.err (!%p596_p6)
}
 0x12a   :  { %s600_s10 = scalar_lea.hbm %s683_s2, 1024 }
 0x12b   :  { %p601_p7 = scmp.ne.s32.totalorder %s683_s2, %s600_s10  ;;  %p604_p8 = scmp.lt.u32.totalorder %s600_s10, %s683_s2 }
 0x12d   :  { %p606_p9 = pnand %p604_p8, %p601_p7 }
 0x12f   :  { %609 = shalt.err (!%p606_p9)
}
 0x130   :  { %357 = dma.vmem_to_hbm [thread:$0]  %s352_s6, 1024, %s683_s2, [#allocation4], %s617_s19, %s617_s19, %s618_s20  }
 0x131   :  { %614 = dma.done.wait [#allocation4], 1024  }
 0x132   :  { %615 = vsyncadd [#allocation4], 4294966272 }
 0x133   :  { %361 = vsyncpa [#allocation3], 1 }
 0x134   :  { %362 = vsyncpa [#allocation6], 1 }
 0x135   :  { %363 = vsyncpa [#allocation4], 1 }

</bundles_post_ra>
